<compile_context>
chip_gen: v7x
topology: tpu7x:2x2x1
jax: 0.10.0
libtpu: 0.0.40
codegen_flags: <defaults>
</compile_context>

<pallas_src>
import functools

import jax
import jax.numpy as jnp
from jax import lax
from jax.experimental import pallas as pl
from jax.experimental.pallas import tpu as pltpu


def _plm_head_kernel(x_ref, w_ref, shift_ref, out_ref, *, seq_len, tb):
    """One batch-block grid step.

    x_ref     : [TB, L, d_in]      bf16 token features (no padding)
    w_ref     : [3, d_in, d_out]   bf16 conv weights, BN scale pre-folded
    shift_ref : [1, d_out]         f32 folded (conv bias + BatchNorm) shift
    out_ref   : [TB, 1, d_out]     f32 pooled output
    """
    L = seq_len
    d_in = x_ref.shape[-1]
    d_out = out_ref.shape[-1]
    M = tb * L

    x = x_ref[...].reshape(M, d_in)                                  # [M, d_in]

    # Conv1d(k=3, padding='same') as three full-K MXU matmuls.  The +/-1 taps
    # are realigned by rotating the f32 *results* along the sublane axis
    # (XLU, effectively free while the MXU is busy) and zeroing the rows that
    # wrapped across a sequence boundary (this also implements the zero
    # padding at both ends of every sequence in the flattened batch block).
    y_c = jnp.dot(x, w_ref[1], preferred_element_type=jnp.float32)   # x[t]
    y_m = jnp.dot(x, w_ref[0], preferred_element_type=jnp.float32)   # x[t-1] tap
    y_p = jnp.dot(x, w_ref[2], preferred_element_type=jnp.float32)   # x[t+1] tap

    # Position of each flattened row inside its own sequence (static pattern).
    pos = lax.broadcasted_iota(jnp.int32, (tb, L, d_out), 1).reshape(M, d_out)
    y_m = jnp.where(pos != 0, pltpu.roll(y_m, 1, axis=0), 0.0)
    y_p = jnp.where(pos != L - 1, pltpu.roll(y_p, M - 1, axis=0), 0.0)

    y = y_c + y_m + y_p + shift_ref[...]        # conv bias + BatchNorm (folded)
    y = jnp.maximum(y, 0.0)                     # ReLU
    # TODO(synk): Dropout is identity in eval mode; training-mode dropout would
    # use pltpu.prng_seed / pltpu.stateful_bernoulli here.

    m = jnp.sum(y.reshape(tb, L, d_out), axis=1) * (1.0 / L)   # mean over seq
    out_ref[...] = m.reshape(tb, 1, d_out).astype(out_ref.dtype)


def plm_encoder_head(seq_feats, conv_w, conv_b, bn_gamma, bn_beta, bn_mean,
                     bn_var, *, eps=1e-5, tb=2,
                     vmem_limit_bytes=48 * 1024 * 1024):
    """Pallas forward of PLMEncoder after the (frozen) BERT encoder.

    seq_feats: [B, L, PLM_dim]  BERT token-level output (the PyTorch code's
               misnamed `pooled_output`); bf16 preferred, any float accepted.
    conv_w:    [out_dim, PLM_dim, 3]  (PyTorch Conv1d weight layout)
    Returns:   [B, 1, out_dim] f32  == prot_out of the PyTorch module (eval).
    """
    B, L, d_in = seq_feats.shape
    d_out = conv_w.shape[0]
    if B % tb != 0:
        tb = 1

    # Fold eval-mode BatchNorm into the conv:  s = gamma / sqrt(var + eps),
    # w' = w * s (per output channel), shift' = bias*s + beta - mean*s.
    s = bn_gamma / jnp.sqrt(bn_var + eps)
    w_t = (jnp.transpose(conv_w, (2, 1, 0)) * s[None, None, :]).astype(jnp.bfloat16)
    shift = (conv_b * s + bn_beta - bn_mean * s).reshape(1, d_out).astype(jnp.float32)

    x = seq_feats.astype(jnp.bfloat16)   # no-op if the encoder already emits bf16

    kernel = functools.partial(_plm_head_kernel, seq_len=L, tb=tb)
    grid_spec = pltpu.PrefetchScalarGridSpec(
        num_scalar_prefetch=0,
        grid=(B // tb,),
        in_specs=[
            # x: one (TB, L, d_in) slab per step, auto double-buffered.
            pl.BlockSpec((tb, L, d_in), lambda i: (i, 0, 0)),
            # Weights / shift: constant block index -> fetched once, resident.
            pl.BlockSpec((3, d_in, d_out), lambda i: (0, 0, 0)),
            pl.BlockSpec((1, d_out), lambda i: (0, 0)),
        ],
        out_specs=pl.BlockSpec((tb, 1, d_out), lambda i: (i, 0, 0)),
    )
    return pl.pallas_call(
        kernel,
        out_shape=jax.ShapeDtypeStruct((B, 1, d_out), jnp.float32),
        grid_spec=grid_spec,
        compiler_params=pltpu.CompilerParams(
            dimension_semantics=("parallel",),
            # Demo shapes need only a few hundred KiB; for realistic shapes
            # keep 2*x-slab + resident weights + temporaries under ~56 MiB on
            # v7x (64 MiB physical) / ~100 MiB on v5e/v6e.
            vmem_limit_bytes=vmem_limit_bytes,
        ),
    )(x, w_t, shift)


def _reference(x, conv_w, conv_b, gamma, beta, mean, var, eps=1e-5):
    """Pure-JAX reference of the PyTorch forward (eval mode), f32."""
    x = x.astype(jnp.float32)
    x_perm = jnp.transpose(x, (0, 2, 1))                    # [B, C_in, L]
    y = lax.conv_general_dilated(
        x_perm, conv_w, window_strides=(1,), padding="SAME",
        dimension_numbers=("NCH", "OIH", "NCH"),
        precision=lax.Precision.HIGHEST)                    # [B, C_out, L]
    y = y + conv_b[None, :, None]
    scale = gamma / jnp.sqrt(var + eps)
    shift = beta - mean * scale
    y = jnp.maximum(y * scale[None, :, None] + shift[None, :, None], 0.0)
    m = jnp.mean(y, axis=2, keepdims=True)                  # [B, C_out, 1]
    return jnp.transpose(m, (0, 2, 1))                      # [B, 1, C_out]


if __name__ == "__main__":
    B, L = 4, 16                   # batch of sequences, sequence length
    PLM_dim, out_dim = 256, 128    # lane-dense multiples of 128

    key = jax.random.PRNGKey(0)
    kx, kw, kb, kg, kbe, km, kv = jax.random.split(key, 7)

    # TODO(synk): the frozen BERT encoder (self.bert) is an external module and
    # is not translated; `seq_feats` stands in for its token-level output.
    seq_feats = jax.random.normal(kx, (B, L, PLM_dim), jnp.float32).astype(jnp.bfloat16)

    # PyTorch Conv1d default init: U(-1/sqrt(fan_in), 1/sqrt(fan_in)), fan_in=C_in*k.
    bound = 1.0 / jnp.sqrt(jnp.float32(PLM_dim * 3))
    conv_w = jax.random.uniform(kw, (out_dim, PLM_dim, 3), jnp.float32, -bound, bound)
    conv_b = jax.random.uniform(kb, (out_dim,), jnp.float32, -bound, bound)

    # BatchNorm1d (eval mode) parameters / running stats.
    bn_gamma = 1.0 + 0.1 * jax.random.normal(kg, (out_dim,), jnp.float32)
    bn_beta = 0.1 * jax.random.normal(kbe, (out_dim,), jnp.float32)
    bn_mean = 0.05 * jax.random.normal(km, (out_dim,), jnp.float32)
    bn_var = jnp.abs(1.0 + 0.1 * jax.random.normal(kv, (out_dim,), jnp.float32))

    out = plm_encoder_head(seq_feats, conv_w, conv_b, bn_gamma, bn_beta,
                           bn_mean, bn_var, tb=2)
    out = jax.block_until_ready(out)

    ref = _reference(seq_feats, conv_w, conv_b, bn_gamma, bn_beta, bn_mean, bn_var)
    assert out.shape == (B, 1, out_dim)
    assert jnp.allclose(out, ref, atol=1e-2, rtol=1e-2), "mismatch vs reference"

    print("KERNEL_OK")
</pallas_src>

<mosaic_0001>
module attributes {stable_mosaic.version = 11 : i64} {
  func.func @_plm_head_kernel(%arg0: i32, %arg1: memref<2x16x256xbf16, #tpu.memory_space<vmem>>, %arg2: memref<3x256x128xbf16, #tpu.memory_space<vmem>>, %arg3: memref<1x128xf32, #tpu.memory_space<vmem>>, %arg4: memref<2x1x128xf32, #tpu.memory_space<vmem>>) attributes {dimension_semantics = [#tpu.dimension_semantics<parallel>], iteration_bounds = array<i64: 2>, scalar_prefetch = 0 : i64, scratch_operands = 0 : i64, tpu.core_type = #tpu.core_type<tc>, window_params = [{transform_indices = @transform_0, window_bounds = array<i64: 2, 16, 256>}, {pipeline_mode = #tpu.pipeline_mode<synchronous>, transform_indices = @transform_1, window_bounds = array<i64: 3, 256, 128>}, {pipeline_mode = #tpu.pipeline_mode<synchronous>, transform_indices = @transform_2, window_bounds = array<i64: 1, 128>}, {transform_indices = @transform_3, window_bounds = array<i64: 2, 1, 128>}]} {
    %c0 = arith.constant 0 : index
    %c0_0 = arith.constant 0 : index
    %c0_1 = arith.constant 0 : index
    %0 = vector.load %arg1[%c0, %c0_0, %c0_1] : memref<2x16x256xbf16, #tpu.memory_space<vmem>>, vector<2x16x256xbf16>
    %1 = vector.shape_cast %0 : vector<2x16x256xbf16> to vector<32x256xbf16>
    %c1 = arith.constant 1 : index
    %c0_2 = arith.constant 0 : index
    %c0_3 = arith.constant 0 : index
    %2 = vector.load %arg2[%c1, %c0_2, %c0_3] : memref<3x256x128xbf16, #tpu.memory_space<vmem>>, vector<1x256x128xbf16>
    %3 = vector.shape_cast %2 : vector<1x256x128xbf16> to vector<256x128xbf16>
    %cst = arith.constant dense<0.000000e+00> : vector<32x128xf32>
    %4 = tpu.matmul %1, %3, %cst {dimension_numbers = #tpu.dot_dimension_numbers<[1], [0], [0], [1], [0, 0, 1, 1], [], []>} : vector<32x256xbf16>, vector<256x128xbf16>, vector<32x128xf32> -> vector<32x128xf32>
    %c0_4 = arith.constant 0 : index
    %c0_5 = arith.constant 0 : index
    %c0_6 = arith.constant 0 : index
    %5 = vector.load %arg2[%c0_4, %c0_5, %c0_6] : memref<3x256x128xbf16, #tpu.memory_space<vmem>>, vector<1x256x128xbf16>
    %6 = vector.shape_cast %5 : vector<1x256x128xbf16> to vector<256x128xbf16>
    %cst_7 = arith.constant dense<0.000000e+00> : vector<32x128xf32>
    %7 = tpu.matmul %1, %6, %cst_7 {dimension_numbers = #tpu.dot_dimension_numbers<[1], [0], [0], [1], [0, 0, 1, 1], [], []>} : vector<32x256xbf16>, vector<256x128xbf16>, vector<32x128xf32> -> vector<32x128xf32>
    %c2 = arith.constant 2 : index
    %c0_8 = arith.constant 0 : index
    %c0_9 = arith.constant 0 : index
    %8 = vector.load %arg2[%c2, %c0_8, %c0_9] : memref<3x256x128xbf16, #tpu.memory_space<vmem>>, vector<1x256x128xbf16>
    %9 = vector.shape_cast %8 : vector<1x256x128xbf16> to vector<256x128xbf16>
    %cst_10 = arith.constant dense<0.000000e+00> : vector<32x128xf32>
    %10 = tpu.matmul %1, %9, %cst_10 {dimension_numbers = #tpu.dot_dimension_numbers<[1], [0], [0], [1], [0, 0, 1, 1], [], []>} : vector<32x256xbf16>, vector<256x128xbf16>, vector<32x128xf32> -> vector<32x128xf32>
    %11 = tpu.iota {dimensions = array<i32: 1>} : vector<2x16x128xi32>
    %12 = vector.shape_cast %11 : vector<2x16x128xi32> to vector<32x128xi32>
    %c0_i32 = arith.constant 0 : i32
    %13 = vector.broadcast %c0_i32 : i32 to vector<32x128xi32>
    %14 = arith.cmpi ne, %12, %13 : vector<32x128xi32>
    %c1_i32 = arith.constant 1 : i32
    %15 = tpu.dynamic_rotate %7 by %c1_i32 dim 0 : vector<32x128xf32>, i32 -> vector<32x128xf32>
    %cst_11 = arith.constant 0.000000e+00 : f32
    %16 = vector.broadcast %cst_11 : f32 to vector<32x128xf32>
    %17 = arith.select %14, %15, %16 : vector<32x128xi1>, vector<32x128xf32>
    %c15_i32 = arith.constant 15 : i32
    %18 = vector.broadcast %c15_i32 : i32 to vector<32x128xi32>
    %19 = arith.cmpi ne, %12, %18 : vector<32x128xi32>
    %c31_i32 = arith.constant 31 : i32
    %20 = tpu.dynamic_rotate %10 by %c31_i32 dim 0 : vector<32x128xf32>, i32 -> vector<32x128xf32>
    %cst_12 = arith.constant 0.000000e+00 : f32
    %21 = vector.broadcast %cst_12 : f32 to vector<32x128xf32>
    %22 = arith.select %19, %20, %21 : vector<32x128xi1>, vector<32x128xf32>
    %23 = arith.addf %4, %17 : vector<32x128xf32>
    %24 = arith.addf %23, %22 : vector<32x128xf32>
    %c0_13 = arith.constant 0 : index
    %c0_14 = arith.constant 0 : index
    %25 = vector.load %arg3[%c0_13, %c0_14] : memref<1x128xf32, #tpu.memory_space<vmem>>, vector<1x128xf32>
    %26 = vector.broadcast %25 : vector<1x128xf32> to vector<32x128xf32>
    %27 = arith.addf %24, %26 : vector<32x128xf32>
    %cst_15 = arith.constant 0.000000e+00 : f32
    %28 = vector.broadcast %cst_15 : f32 to vector<32x128xf32>
    %29 = arith.maximumf %27, %28 : vector<32x128xf32>
    %30 = vector.shape_cast %29 : vector<32x128xf32> to vector<2x16x128xf32>
    %cst_16 = arith.constant dense<0.000000e+00> : vector<2x128xf32>
    %31 = vector.multi_reduction <add>, %30, %cst_16 [1] : vector<2x16x128xf32> to vector<2x128xf32>
    %cst_17 = arith.constant 6.250000e-02 : f32
    %32 = vector.broadcast %cst_17 : f32 to vector<2x128xf32>
    %33 = arith.mulf %31, %32 : vector<2x128xf32>
    %34 = vector.shape_cast %33 : vector<2x128xf32> to vector<2x1x128xf32>
    %c0_18 = arith.constant 0 : index
    %c0_19 = arith.constant 0 : index
    %c0_20 = arith.constant 0 : index
    %35 = vector.load %arg4[%c0_18, %c0_19, %c0_20] : memref<2x1x128xf32, #tpu.memory_space<vmem>>, vector<2x1x128xf32>
    tpu.vector_store %arg4[%c0_18, %c0_19, %c0_20], %34 {strides = array<i32>} : memref<2x1x128xf32, #tpu.memory_space<vmem>>, vector<2x1x128xf32>,
    return
  }
  func.func @transform_0(%arg0: i32) -> (i32, i32, i32) {
    %c0_i32 = arith.constant 0 : i32
    %c0_i32_0 = arith.constant 0 : i32
    %c0_i32_1 = arith.constant 0 : i32
    return %arg0, %c0_i32, %c0_i32_0 : i32, i32, i32
  }
  func.func @transform_1(%arg0: i32) -> (i32, i32, i32) {
    %c0_i32 = arith.constant 0 : i32
    %c0_i32_0 = arith.constant 0 : i32
    %c0_i32_1 = arith.constant 0 : i32
    %c0_i32_2 = arith.constant 0 : i32
    return %c0_i32, %c0_i32_0, %c0_i32_1 : i32, i32, i32
  }
  func.func @transform_2(%arg0: i32) -> (i32, i32) {
    %c0_i32 = arith.constant 0 : i32
    %c0_i32_0 = arith.constant 0 : i32
    %c0_i32_1 = arith.constant 0 : i32
    return %c0_i32, %c0_i32_0 : i32, i32
  }
  func.func @transform_3(%arg0: i32) -> (i32, i32, i32) {
    %c0_i32 = arith.constant 0 : i32
    %c0_i32_0 = arith.constant 0 : i32
    %c0_i32_1 = arith.constant 0 : i32
    return %arg0, %c0_i32, %c0_i32_0 : i32, i32, i32
  }
}

</mosaic_0001>

<bundles_post_ra>
// kernel: tpu_custom_call.1
= control target key start
LH: loop header
LB: loop body
LE: loop exit
PB: predicated region body
PF: predicated region fallthrough
CT: control target
= control target key end

     0   :  { %8 = vsyncpa [#allocation3], 0  ;;  %s1600_s0 = inlined_call_operand.hbm [shape: bf16[4,16,256], index: 0, kind: input, shape index: {}]   ;;  %s1601_s1 = inlined_call_operand.hbm [shape: bf16[3,256,128], index: 1, kind: input, shape index: {}]   ;;  %s1602_s2 = inlined_call_operand.vmem [shape: f32[1,128], index: 2, kind: input, shape index: {}]   ;;  %s1603_s3 = inlined_call_operand.hbm [shape: f32[4,1,128], index: 3, kind: output, shape index: {}]  }
   0x1   :  { %10 = vsyncpa [#allocation3 + $0x1], 0 }
   0x2   :  { %11 = vsyncpa [#allocation6], 0 }
   0x3   :  { %12 = vsyncpa [#allocation4], 0 }
   0x4   :  { %14 = vsyncpa [#allocation4 + $0x1], 0  ;;  %s1381_s12 = smov 0   ;;  %s1383_s13 = smov 0  }
   0x5   :  { %s1385_s14 = smov 0   ;;  %s1387_s15 = smov 0  }
   0x6 LB: > { %s1402_s16 = sadd.s32 4294967295, %s1350_s15   ;;  %s932_s17 = sadd.s32 4294967294, %s1350_s15   ;;  %s1350_s15 = sphi %s1387_s15, %s1623_s15   ;;  %s1346_s14 = sphi %s1385_s14, %s1622_s14   ;;  %s1342_s13 = sphi %s1383_s13, %s1621_s13   ;;  %s1338_s12 = sphi %s1381_s12, %s1620_s12  }
   0x7   : > { %p40_p0 = scmp.ne.s32.totalorder %s1342_s13, %s1338_s12  ;;  %p1604_p1 = scmp.eq.s32.totalorder %s1402_s16, 0 }
   0x8   : > { %p112_p3 = scmp.eq.s32.totalorder %s932_s17, 1  ;;  %p933_p5 = scmp.ge.s32.totalorder %s1350_s15, 1 }
   0x9   : > { %p1411_p4 = por %p1604_p1, %p40_p0  ;;  %p119_p7 = scmp.lt.s32.totalorder %s1350_s15, 3 }
   0xa   : > { %p1416_p6 = por %p112_p3, %p40_p0  ;;  %s1352_s21 = smov [#allocation5]  }
   0xb   : > { %s1607_s18 = scalar_select %p1411_p4, 1, 0 }
   0xc   : > { %s1608_s19 = scalar_select %p1416_p6, 1, 0 }
   0xd   : > { %p1421_p8 = pnand %p933_p5, %p119_p7  ;;  %s131_s22 = sshll.u32 %s1352_s21, 4  ;;  %s1425_s22 = int_to_ptr.vmem [resolvable:$true] %s131_s22 }
   0xe   : > { %s1437_s24 = sadd.s32 1, %s1350_s15   ;;  %s27_s25 = sadd.s32 1, %s1346_s14 }
   0xf   : > { %s1609_s20 = scalar_select %p1421_p8, 1, 0 }
  0x10   : > { %p1113_p9 = pneg %p1421_p8  ;;  %s24_s26 = ssub.s32 %s1350_s15, %s1437_s24 }
  0x11   : > { %s1222_s29 = scalar_lea.hbm %s1601_s1, 6144 }
  0x12   : > { %p1432_p11 = pnand %p1113_p9, %p1604_p1  ;;  %p1223_p12 = scmp.ne.s32.totalorder %s1601_s1, %s1222_s29 }
  0x13   : > { %p1229_p5 = scmp.lt.u32.totalorder %s1222_s29, %s1601_s1 }
  0x14   : > { %p1224_p13 = pneg %p1432_p11 }
  0x16   : > { %p1225_p0 = pnand %p1224_p13, %p1223_p12 }
  0x18   : > { %p1226_p3 = pneg %p1225_p0 }
  0x1a   : > { %p1231_p7 = pnand %p1229_p5, %p1226_p3 }
  0x1c   : > { %1234 = shalt.err (!%p1231_p7)
}
  0x1d   : > { %s1235_s7 = scalar_lea.vmem %s1425_s22, 6144  ;;  %p1243_p2 = scmp.lt.s32.totalorder %s1425_s22, %s1425_s22 }
  0x1e   : > { %p1236_p9 = scmp.ne.s32.totalorder %s1425_s22, %s1235_s7  ;;  %p1244_p6 = scmp.lt.s32.totalorder %s1235_s7, %s1235_s7 }
  0x20   : > { %p1238_p10 = pnand %p1236_p9, %p1224_p13  ;;  %p1245_p4 = por %p1244_p6, %p1243_p2 }
  0x22   : > { %p1239_p1 = pneg %p1238_p10 }
  0x24   : > { %p1246_p8 = pnand %p1245_p4, %p1239_p1 }
  0x26   : > { %1249 = shalt.err (!%p1246_p8)
}
  0x27   : > { %s1353_s8 = smov 64   ;;  %s1354_s9 = smov 4  }
  0x28   : > { %1116 = dma.hbm_to_vmem [thread:$0]  (!%p1432_p11), %s1601_s1, 6144, %s1425_s22, [#allocation6], %s1353_s8, %s1353_s8, %s1354_s9  }
  0x29   : > { %p25_p2 = scmp.eq.s32.totalorder %s24_s26, 0  ;;  %p34_p1 = scmp.ne.s32.totalorder %s1346_s14, %s1342_s13 }
  0x2a   : > { %p35_p4 = scmp.eq.s32.totalorder %s1350_s15, 0  ;;  %p1126_p6 = scmp.lt.s32.totalorder %s1350_s15, 2 }
  0x2b   : > { %s1468_s17 = scalar_select %p25_p2, %s1346_s14, %s27_s25  }
  0x2c   : > { %p36_p8 = por %p35_p4, %p34_p1  ;;  %p1611_p10 = scmp.eq.s32.totalorder %s1402_s16, 1 }
  0x2d   : > { %s148_s27 = sand.u32 1, %s1346_s14   ;;  %s1003_s28 = sshll.u32 %s1350_s15, 9 }
  0x2e   : > { %p1472_p12 = por %p1611_p10, %p34_p1  ;;  %s936_s29 = sshll.u32 %s148_s27, 5 }
  0x2f   : > { %s1481_s4 = scalar_lea.hbm %s1600_s0, %s1003_s28  ;;  %s152_s22 = scalar_lea.vmem [#allocation2], %s936_s29 }
  0x30   : > { %s160_s25 = sshll.u32 %s152_s22, 4  ;;  %p1483_p11 = pnand %p1126_p6, %p36_p8  ;;  %s1487_s25 = int_to_ptr.vmem [resolvable:$true] %s160_s25 }
  0x31   : > { %s1489_s5 = scalar_lea.sflag [#allocation3], %s148_s27  ;;  %s1250_s6 = scalar_lea.hbm %s1481_s4, 512 }
  0x32   : > { %p1251_p13 = scmp.ne.s32.totalorder %s1481_s4, %s1250_s6  ;;  %p1252_p0 = pneg %p1483_p11 }
  0x33   : > { %s1255_s9 = scalar_lea.hbm %s1600_s0, 1024  ;;  %p1256_p7 = scmp.lt.u32.totalorder %s1481_s4, %s1600_s0 }
  0x34   : > { %p1253_p3 = pnand %p1252_p0, %p1251_p13  ;;  %p1257_p9 = scmp.lt.u32.totalorder %s1255_s9, %s1250_s6 }
  0x35   : > { %p1259_p1 = scmp.lt.u32.totalorder %s1250_s6, %s1481_s4 }
  0x36   : > { %p1254_p5 = pneg %p1253_p3  ;;  %p1258_p2 = por %p1257_p9, %p1256_p7 }
  0x38   : > { %p1260_p4 = por %p1259_p1, %p1258_p2 }
  0x3a   : > { %p1261_p6 = pnand %p1260_p4, %p1254_p5 }
  0x3c   : > { %1264 = shalt.err (!%p1261_p6)
}
  0x3d   : > { %s1265_s27 = scalar_lea.vmem %s1487_s25, 512  ;;  %s1355_s28 = smov [#allocation2]  }
  0x3e   : > { %p1266_p8 = scmp.ne.s32.totalorder %s1487_s25, %s1265_s27  ;;  %s1270_s29 = sshll.u32 %s1355_s28, 4  ;;  %s1271_s29 = int_to_ptr.vmem [resolvable:$false] %s1270_s29 }
  0x3f   : > { %s1272_s23 = scalar_lea.vmem %s1271_s29, 1024  ;;  %p1273_p3 = scmp.lt.s32.totalorder %s1487_s25, %s1271_s29 }
  0x40   : > { %p1268_p10 = pnand %p1266_p8, %p1252_p0  ;;  %p1274_p7 = scmp.lt.s32.totalorder %s1272_s23, %s1265_s27 }
  0x42   : > { %p1269_p13 = pneg %p1268_p10  ;;  %p1275_p9 = por %p1274_p7, %p1273_p3 }
  0x44   : > { %p1276_p2 = pnand %p1275_p9, %p1269_p13 }
  0x46   : > { %1279 = shalt.err (!%p1276_p2)
}
  0x47   : > { %s1356_s30 = smov 128   ;;  %s1357_s22 = smov 8  }
  0x48   : > { %1120 = dma.hbm_to_vmem [thread:$0]  (!%p1483_p11), %s1481_s4, 512, %s1487_s25, %s1489_s5, %s1356_s30, %s1356_s30, %s1357_s22  }
  0x49   : > { %p1614_p0 = scmp.ne.s32.totalorder %s1609_s20, 0 }
  0x4a   : > { %s1520_s6 = sand.u32 (!%p1614_p0), 1, %s1342_s13   ;;  %p1615_p5 = scmp.ne.s32.totalorder (!%p1614_p0), %s1607_s18, 0 }
  0x4b   : > { %172 = sbr.rel (%p1614_p0) target bundleno = 410 (0x19a), region = 32  ;;  %s941_s7 = sshll.u32 (!%p1614_p0), %s1520_s6, 5 }
  0x4c   : > { %s175_s8 = scalar_lea.sflag (!%p1614_p0), [#allocation3], %s1520_s6  ;;  %s1524_s9 = scalar_lea.vmem (!%p1614_p0), [#allocation2], %s941_s7 }
  0x52   : > { %1325 = dma.done.wait (%p1615_p5), %s175_s8, 512  }
  0x53   : > { %1327 = vsyncadd (%p1615_p5), %s175_s8, 4294966784  ;;  %p1616_p11 = scmp.eq.s32.totalorder %s1402_s16, 0 }
  0x55   : > { %1329 = dma.done.wait (%p1616_p11), [#allocation6], 6144   ;;  %p1617_p1 = pmov %p1616_p11 }
  0x56   : > { %v1168_v0 = vld [vmem:[#allocation5 + $0x40] sm:$0xff]   ;;  %v1172_v4 = vld [vmem:[#allocation5 + $0x48] sm:$0xff]   ;;  %v1176_v8 = vld [vmem:[#allocation5 + $0x50] sm:$0xff]   ;;  %v620_v52 = vlaneseq  ;;  %s943_s4 = sshll.u32 %s1520_s6, 1  ;;  %s1004_s25 = sshll.u32 %s1402_s16, 5 }
  0x57   : > { %1331 = vsyncadd (%p1617_p1), [#allocation6], 4294961152  ;;  %v1169_v1 = vld [vmem:[#allocation5 + $0x140] sm:$0xff]   ;;  %1005 = vmatprep.subr.bf16.mxu0 %v1168_v0  ;;  %v1173_v5 = vld [vmem:[#allocation5 + $0x148] sm:$0xff]   ;;  %s204_s26 = scalar_lea.vmem [#allocation7], %s943_s4  ;;  %s1554_s27 = scalar_lea.hbm %s1603_s3, %s1004_s25 }
  0x58   : > { %v1170_v2 = vld [vmem:[#allocation5] sm:$0xff]   ;;  %1033 = vmatprep.subr.bf16.mxu1 %v1169_v1  ;;  %v1174_v6 = vld [vmem:[#allocation5 + $0x8] sm:$0xff]   ;;  %v1177_v9 = vld [vmem:[#allocation5 + $0x150] sm:$0xff]   ;;  %v621_v56 = vshrl.u32 %v620_v52, 7  ;;  %s849_s5 = sshll.u32 %s204_s26, 4  ;;  %s836_s28 = scalar_lea.sflag [#allocation4], %s1520_s6  ;;  %s1556_s5 = int_to_ptr.vmem [resolvable:$true] %s849_s5 }
  0x59   : > { %v1171_v3 = vld [vmem:[#allocation5 + $0x100] sm:$0xff]   ;;  %1006 = vmatpush3.bf16.msra.mxu0 %v1170_v2  ;;  %v1175_v7 = vld [vmem:[#allocation5 + $0x108] sm:$0xff]   ;;  %v1178_v10 = vld [vmem:[#allocation5 + $0x10] sm:$0xff]   ;;  %s1280_s16 = scalar_lea.vmem %s1556_s5, 32  ;;  %s1358_s29 = smov [#allocation7]  }
  0x5a   : > { %1034 = vmatpush3.bf16.msra.mxu1 %v1171_v3  ;;  %1007 = vmatprep.subr.bf16.mxu0 %v1172_v4  ;;  %v1179_v11 = vld [vmem:[#allocation5 + $0x110] sm:$0xff]   ;;  %v1180_v12 = vld [vmem:[#allocation5 + $0x58] sm:$0xff]   ;;  %v1184_v16 = vld [vmem:[#allocation5 + $0x60] sm:$0xff]   ;;  %vm629_vm0 = vcmp.lt.s32.totalorder %v621_v56, 1  ;;  %vm644_vm1 = vcmp.lt.s32.totalorder %v621_v56, 7  ;;  %vm623_vm2 = vcmp.ne.s32.totalorder %v621_v56, 0  ;;  %p1281_p4 = scmp.ne.s32.totalorder %s1556_s5, %s1280_s16 }
  0x5b   : > { %1035 = vmatprep.subr.bf16.mxu1 %v1173_v5  ;;  %v1181_v13 = vld [vmem:[#allocation5 + $0x158] sm:$0xff]   ;;  %v1185_v17 = vld [vmem:[#allocation5 + $0x160] sm:$0xff]   ;;  %v1188_v20 = vld [vmem:[#allocation5 + $0x68] sm:$0xff]   ;;  %s1284_s23 = sshll.u32 %s1358_s29, 4  ;;  %s1285_s23 = int_to_ptr.vmem [resolvable:$false] %s1284_s23 }
  0x5c   : > { %v1182_v14 = vld [vmem:[#allocation5 + $0x18] sm:$0xff]   ;;  %v1186_v18 = vld [vmem:[#allocation5 + $0x20] sm:$0xff]   ;;  %v1189_v21 = vld [vmem:[#allocation5 + $0x168] sm:$0xff]   ;;  %p1282_p6 = pnand %p1281_p4, %p1472_p12  ;;  %s1286_s30 = scalar_lea.vmem %s1285_s23, 64 }
  0x5d   : > { %1008 = vmatpush3.bf16.msra.mxu0 %v1174_v6  ;;  %v1183_v15 = vld [vmem:[#allocation5 + $0x118] sm:$0xff]   ;;  %v1187_v19 = vld [vmem:[#allocation5 + $0x120] sm:$0xff]   ;;  %v1190_v22 = vld [vmem:[#allocation5 + $0x28] sm:$0xff]   ;;  %p1287_p10 = scmp.lt.s32.totalorder %s1556_s5, %s1285_s23  ;;  %p1288_p13 = scmp.lt.s32.totalorder %s1286_s30, %s1280_s16 }
  0x5e   : > { %1036 = vmatpush3.bf16.msra.mxu1 %v1175_v7  ;;  %1009 = vmatprep.subr.bf16.mxu0 %v1176_v8  ;;  %v1191_v23 = vld [vmem:[#allocation5 + $0x128] sm:$0xff]   ;;  %v1192_v24 = vld [vmem:[#allocation5 + $0x70] sm:$0xff]   ;;  %v1196_v28 = vld [vmem:[#allocation5 + $0x78] sm:$0xff]   ;;  %p1283_p8 = pneg %p1282_p6 }
  0x5f   : > { %1037 = vmatprep.subr.bf16.mxu1 %v1177_v9  ;;  %v1193_v25 = vld [vmem:[#allocation5 + $0x170] sm:$0xff]   ;;  %v1197_v29 = vld [vmem:[#allocation5 + $0x178] sm:$0xff]   ;;  %v1200_v32 = vld [vmem:[%s1524_s9 + $0x4] ss:$8 sps:$4 sm:$0xff]   ;;  %p1289_p3 = por %p1288_p13, %p1287_p10 }
  0x60   : > { %v1194_v26 = vld [vmem:[#allocation5 + $0x30] sm:$0xff]   ;;  %v1198_v30 = vld [vmem:[#allocation5 + $0x38] sm:$0xff]   ;;  %v1202_v33 = vld [vmem:[%s1524_s9] ss:$8 sps:$4 sm:$0xff]   ;;  %425 = vmatprep.mubr.bf16.mxu0 %v1200_v32  ;;  %603 = vmatprep.mubr.bf16.mxu1 %v1200_v32 }
  0x61   : > { %1010 = vmatpush3.bf16.msra.mxu0 %v1178_v10  ;;  %v1195_v27 = vld [vmem:[#allocation5 + $0x130] sm:$0xff]   ;;  %v1199_v31 = vld [vmem:[#allocation5 + $0x138] sm:$0xff]   ;;  %v1203_v34 = vld [vmem:[#allocation5 + $0xc0] sm:$0xff]   ;;  %p1290_p7 = pnand %p1289_p3, %p1283_p8 }
  0x62   : > { %1038 = vmatpush3.bf16.msra.mxu1 %v1179_v11  ;;  %1011 = vmatprep.subr.bf16.mxu0 %v1180_v12  ;;  %v1204_v35 = vld [vmem:[#allocation5 + $0x80] sm:$0xff]   ;;  %v1205_v36 = vld [vmem:[#allocation5 + $0xc8] sm:$0xff]   ;;  %v1207_v38 = vld [vmem:[%s1524_s9 + $0x14] ss:$8 sps:$4 sm:$0xff]  }
  0x63   : > { %1039 = vmatprep.subr.bf16.mxu1 %v1181_v13  ;;  %v1206_v37 = vld [vmem:[#allocation5 + $0x88] sm:$0xff]   ;;  %v1209_v39 = vld [vmem:[%s1524_s9 + $0x10] ss:$8 sps:$4 sm:$0xff]   ;;  %v1214_v44 = vld [vmem:[#allocation5 + $0xe0] sm:$0xff]  }
  0x64   : > { %v1210_v40 = vld [vmem:[#allocation5 + $0xd0] sm:$0xff]   ;;  %v1212_v42 = vld [vmem:[#allocation5 + $0xd8] sm:$0xff]   ;;  %v1215_v45 = vld [vmem:[#allocation5 + $0xa0] sm:$0xff]  }
  0x65   : > { %1012 = vmatpush3.bf16.msra.mxu0 %v1182_v14  ;;  %v1211_v41 = vld [vmem:[#allocation5 + $0x90] sm:$0xff]   ;;  %v1213_v43 = vld [vmem:[#allocation5 + $0x98] sm:$0xff]   ;;  %v1216_v46 = vld [vmem:[#allocation5 + $0xe8] sm:$0xff]  }
  0x66   : > { %1040 = vmatpush3.bf16.msra.mxu1 %v1183_v15  ;;  %1013 = vmatprep.subr.bf16.mxu0 %v1184_v16  ;;  %v1217_v47 = vld [vmem:[#allocation5 + $0xa8] sm:$0xff]   ;;  %v1218_v48 = vld [vmem:[#allocation5 + $0xf0] sm:$0xff]   ;;  %v1220_v50 = vld [vmem:[#allocation5 + $0xf8] sm:$0xff]  }
  0x67   : > { %1041 = vmatprep.subr.bf16.mxu1 %v1185_v17  ;;  %v1219_v49 = vld [vmem:[#allocation5 + $0xb0] sm:$0xff]   ;;  %v1221_v51 = vld [vmem:[#allocation5 + $0xb8] sm:$0xff]  }
  0x69   : > { %1014 = vmatpush3.bf16.msra.mxu0 %v1186_v18 }
  0x6a   : > { %1042 = vmatpush3.bf16.msra.mxu1 %v1187_v19  ;;  %1015 = vmatprep.subr.bf16.mxu0 %v1188_v20 }
  0x6b   : > { %1043 = vmatprep.subr.bf16.mxu1 %v1189_v21 }
  0x6d   : > { %1016 = vmatpush3.bf16.msra.mxu0 %v1190_v22 }
  0x6e   : > { %1044 = vmatpush3.bf16.msra.mxu1 %v1191_v23  ;;  %1017 = vmatprep.subr.bf16.mxu0 %v1192_v24 }
  0x6f   : > { %1045 = vmatprep.subr.bf16.mxu1 %v1193_v25 }
  0x71   : > { %1018 = vmatpush3.bf16.msra.mxu0 %v1194_v26 }
  0x72   : > { %1046 = vmatpush3.bf16.msra.mxu1 %v1195_v27  ;;  %1019 = vmatprep.subr.bf16.mxu0 %v1196_v28 }
  0x73   : > { %1047 = vmatprep.subr.bf16.mxu1 %v1197_v29 }
  0x75   : > { %1020 = vmatpush3.bf16.msra.mxu0 %v1198_v30 }
  0x76   : > { %1048 = vmatpush3.bf16.msra.mxu1 %v1199_v31  ;;  %1061 = vmatprep.subr.bf16.mxu0 %v1203_v34  ;;  %v622_v31 = vadd.s32 8, %v621_v56 }
  0x77   : > { %1089 = vmatprep.subr.bf16.mxu1 %v1203_v34 }
  0x78   : > { %426 = vmatmul.mubr.bf16.vlgmr.msra.gmra.mrb[0].mxu0 %v1202_v33  ;;  %vm639_vm3 = vcmp.ne.s32.totalorder %v622_v31, 15 }
  0x79   : > { %604 = vmatmul.mubr.bf16.vlgmr.msra.gmra.mrb[0].mxu1 %v1202_v33  ;;  %1062 = vmatpush3.bf16.msra.mxu0 %v1204_v35 }
  0x7a   : > { %1097 = vmatpush3.bf16.msra.mxu1 %v1204_v35  ;;  %1063 = vmatprep.subr.bf16.mxu0 %v1205_v36 }
  0x7b   : > { %1090 = vmatprep.subr.bf16.mxu1 %v1205_v36  ;;  %433 = vmatprep.mubr.bf16.mxu0 %v1207_v38 }
  0x7c   : > { %611 = vmatprep.mubr.bf16.mxu1 %v1207_v38 }
  0x7d   : > { %1064 = vmatpush3.bf16.msra.mxu0 %v1206_v37 }
  0x7e   : > { %1098 = vmatpush3.bf16.msra.mxu1 %v1206_v37  ;;  %1065 = vmatprep.subr.bf16.mxu0 %v1210_v40 }
  0x7f   : > { %1091 = vmatprep.subr.bf16.mxu1 %v1210_v40 }
  0x80   : > { %434 = vmatmul.mubr.bf16.gmra.mrb[4].mxu0 %v1209_v39 }
  0x81   : > { %612 = vmatmul.mubr.bf16.gmra.mrb[4].mxu1 %v1209_v39  ;;  %781 = vmatprep.mubr.bf16.mxu0 %v1200_v32 }
  0x82   : > { %1066 = vmatpush3.bf16.msra.mxu0 %v1211_v41  ;;  %789 = vmatprep.mubr.bf16.mxu1 %v1207_v38 }
  0x83   : > { %1099 = vmatpush3.bf16.msra.mxu1 %v1211_v41  ;;  %1067 = vmatprep.subr.bf16.mxu0 %v1212_v42 }
  0x84   : > { %1092 = vmatprep.subr.bf16.mxu1 %v1212_v42 }
  0x86   : > { %1068 = vmatpush3.bf16.msra.mxu0 %v1213_v43 }
  0x87   : > { %1100 = vmatpush3.bf16.msra.mxu1 %v1213_v43  ;;  %1069 = vmatprep.subr.bf16.mxu0 %v1214_v44 }
  0x88   : > { %1093 = vmatprep.subr.bf16.mxu1 %v1214_v44 }
  0x8a   : > { %1070 = vmatpush3.bf16.msra.mxu0 %v1215_v45 }
  0x8b   : > { %1101 = vmatpush3.bf16.msra.mxu1 %v1215_v45  ;;  %1071 = vmatprep.subr.bf16.mxu0 %v1216_v46  ;;  %v996_v45 = vld [vmem:[%s1602_s2] ss:$0 sm:$0xff] }
  0x8c   : > { %1094 = vmatprep.subr.bf16.mxu1 %v1216_v46 }
  0x8e   : > { %1072 = vmatpush3.bf16.msra.mxu0 %v1217_v47 }
  0x8f   : > { %1102 = vmatpush3.bf16.msra.mxu1 %v1217_v47  ;;  %1073 = vmatprep.subr.bf16.mxu0 %v1218_v48 }
  0x90   : > { %1095 = vmatprep.subr.bf16.mxu1 %v1218_v48 }
  0x92   : > { %1074 = vmatpush3.bf16.msra.mxu0 %v1219_v49 }
  0x93   : > { %1103 = vmatpush3.bf16.msra.mxu1 %v1219_v49  ;;  %1075 = vmatprep.subr.bf16.mxu0 %v1220_v50 }
  0x94   : > { %1096 = vmatprep.subr.bf16.mxu1 %v1220_v50 }
  0x96   : > { %1076 = vmatpush3.bf16.msra.mxu0 %v1221_v51 }
  0x97   : > { %1104 = vmatpush3.bf16.msra.mxu1 %v1221_v51 }
  0x99   : > { %782 = vmatmul.mubr.bf16.vlgmr.msra.gmra.mrb[8].mxu0 %v1202_v33 }
  0x9a   : > { %790 = vmatmul.mubr.bf16.vlgmr.msra.gmra.mrb[8].mxu1 %v1209_v39 }
 0x14b   : > { %v1021_v53 = vpop.f32.mrb[0].mxu0 }
 0x14c   : > { %v1049_v54 = vpop.f32.mrb[0].mxu1  ;;  %v1022_v55 = vpop.f32.mrb[1].mxu0 }
 0x14d   : > { %v1023_v57 = vadd.f32 %v1022_v55, %v1021_v53  ;;  %v1050_v58 = vpop.f32.mrb[1].mxu1  ;;  %v1024_v59 = vpop.f32.mrb[2].mxu0 }
 0x14e   : > { %v1051_v60 = vadd.f32 %v1050_v58, %v1049_v54  ;;  %v1052_v61 = vpop.f32.mrb[2].mxu1  ;;  %v1025_v62 = vpop.f32.mrb[3].mxu0 }
 0x14f   : > { %v1026_v63 = vadd.f32 %v1025_v62, %v1024_v59  ;;  %v1053_v0 = vpop.f32.mrb[3].mxu1  ;;  %v625_v2 = vrot.slane %v1023_v57, 7 }
 0x150   : > { %v1054_v1 = vadd.f32 %v1053_v0, %v1052_v61  ;;  %v640_v4 = vrot.slane %v1051_v60, 1 }
 0x151   : > { %v626_v3 = vrot.slane %v1026_v63, 7 }
 0x152   : > { %v641_v5 = vrot.slane %v1054_v1, 1 }
 0x153   : > { %v1027_v6 = vpop.f32.mrb[4].mxu0  ;;  %v632_v7 = vsel %vm629_vm0, %v625_v2, %v626_v3 }
 0x154   : > { %v1055_v8 = vpop.f32.mrb[4].mxu1  ;;  %v1028_v9 = vpop.f32.mrb[5].mxu0  ;;  %v647_v10 = vsel %vm644_vm1, %v640_v4, %v641_v5 }
 0x155   : > { %v1029_v11 = vadd.f32 %v1028_v9, %v1027_v6  ;;  %v1056_v12 = vpop.f32.mrb[5].mxu1  ;;  %v1030_v13 = vpop.f32.mrb[6].mxu0 }
 0x156   : > { %v1057_v14 = vadd.f32 %v1056_v12, %v1055_v8  ;;  %v1058_v15 = vpop.f32.mrb[6].mxu1  ;;  %v1031_v16 = vpop.f32.mrb[7].mxu0 }
 0x157   : > { %v627_v17 = vrot.slane %v1029_v11, 7  ;;  %v1032_v18 = vadd.f32 %v1031_v16, %v1030_v13  ;;  %v1059_v19 = vpop.f32.mrb[7].mxu1 }
 0x158   : > { %v642_v20 = vrot.slane %v1057_v14, 1  ;;  %v1060_v21 = vadd.f32 %v1059_v19, %v1058_v15 }
 0x159   : > { %v628_v22 = vrot.slane %v1032_v18, 7  ;;  %v631_v23 = vsel %vm629_vm0, %v626_v3, %v627_v17 }
 0x15a   : > { %v646_v24 = vsel %vm644_vm1, %v641_v5, %v642_v20  ;;  %v643_v25 = vrot.slane %v1060_v21, 1  ;;  %v636_v42 = vsel %vm623_vm2, %v631_v23, 0.0 }
 0x15b   : > { %v633_v26 = vsel %vm629_vm0, %v628_v22, %v625_v2  ;;  %v630_v27 = vsel %vm629_vm0, %v627_v17, %v628_v22  ;;  %v650_v51 = vsel %vm639_vm3, %v646_v24, 0.0 }
 0x15c   : > { %v648_v28 = vsel %vm644_vm1, %v643_v25, %v640_v4  ;;  %v645_v29 = vsel %vm644_vm1, %v642_v20, %v643_v25  ;;  %v634_v37 = vsel %vm623_vm2, %v633_v26, 0.0 }
 0x15d   : > { %v652_v55 = vsel %vm639_vm3, %v648_v28, 0.0 }
 0x16c   : > { %v1077_v30 = vpop.f32.mrb[8].mxu0 }
 0x16d   : > { %v1083_v32 = vpop.f32.mrb[8].mxu1  ;;  %v1078_v33 = vpop.f32.mrb[9].mxu0 }
 0x16e   : > { %v1079_v34 = vadd.f32 %v1078_v33, %v1077_v30  ;;  %v1084_v35 = vpop.f32.mrb[9].mxu1  ;;  %v1080_v36 = vpop.f32.mrb[10].mxu0 }
 0x16f   : > { %v1085_v38 = vadd.f32 %v1084_v35, %v1083_v32  ;;  %v1086_v39 = vpop.f32.mrb[10].mxu1  ;;  %v1081_v40 = vpop.f32.mrb[11].mxu0 }
 0x170   : > { %v784_v41 = vadd.f32 %v1079_v34, %v634_v37  ;;  %v1082_v43 = vadd.f32 %v1081_v40, %v1080_v36  ;;  %v1087_v44 = vpop.f32.mrb[11].mxu1 }
 0x171   : > { %v792_v46 = vadd.f32 %v1085_v38, %v636_v42  ;;  %v1088_v47 = vadd.f32 %v1087_v44, %v1086_v39 }
 0x172   : > { %v798_v48 = vadd.f32 %v784_v41, %v647_v10  ;;  %v787_v49 = vadd.f32 %v1082_v43, %v632_v7 }
 0x173   : > { %v800_v50 = vadd.f32 %v792_v46, %v645_v29  ;;  %v795_v52 = vadd.f32 %v1088_v47, %v630_v27 }
 0x174   : > { %v809_v53 = vadd.f32 %v996_v45, %v798_v48  ;;  %v799_v54 = vadd.f32 %v787_v49, %v650_v51 }
 0x175   : > { %v811_v56 = vadd.f32 %v996_v45, %v800_v50  ;;  %v801_v57 = vadd.f32 %v795_v52, %v652_v55 }
 0x176   : > { %v810_v58 = vadd.f32 %v996_v45, %v799_v54  ;;  %v813_v60 = vmax.f32 %v809_v53, 0.0 }
 0x177   : > { %v812_v59 = vadd.f32 %v996_v45, %v801_v57  ;;  %v815_v62 = vmax.f32 %v811_v56, 0.0 }
 0x178   : > { %v814_v61 = vmax.f32 %v810_v58, 0.0 }
 0x179   : > { %v816_v63 = vmax.f32 %v812_v59, 0.0 }
 0x17a   : > { %v817_v0 = vadd.f32 %v814_v61, %v813_v60 }
 0x17b   : > { %v824_v1 = vadd.f32 %v816_v63, %v815_v62 }
 0x17c   : > { %v818_v2 = vrot.slane %v817_v0, 4 }
 0x17d   : > { %v825_v3 = vrot.slane %v824_v1, 4 }
 0x17e   : > { %v819_v4 = vadd.f32 %v818_v2, %v817_v0 }
 0x17f   : > { %v826_v5 = vadd.f32 %v825_v3, %v824_v1 }
 0x180   : > { %v820_v6 = vrot.slane %v819_v4, 2 }
 0x181   : > { %v827_v7 = vrot.slane %v826_v5, 2 }
 0x182   : > { %v821_v8 = vadd.f32 %v820_v6, %v819_v4 }
 0x183   : > { %v828_v9 = vadd.f32 %v827_v7, %v826_v5 }
 0x184   : > { %v822_v10 = vrot.slane %v821_v8, 1 }
 0x185   : > { %v829_v11 = vrot.slane %v828_v9, 1 }
 0x186   : > { %v823_v12 = vadd.f32 %v822_v10, %v821_v8 }
 0x187   : > { %v830_v13 = vadd.f32 %v829_v11, %v828_v9 }
 0x188   : > { %v831_v14 = vmul.f32 0.0625, %v823_v12 }
 0x189   : > { %v832_v15 = vmul.f32 0.0625, %v830_v13 }
 0x18a   : > { %833 = vst [vmem:[%s204_s26] sm:$0x1] %v831_v14 }
 0x18b   : > { %834 = vst [vmem:[%s204_s26 + $0x1] sm:$0x1] %v832_v15 }
 0x18c   : > { %1293 = shalt.err (!%p1290_p7)
}
 0x18d   : > { %s1294_s22 = scalar_lea.hbm %s1554_s27, 32  ;;  %s1298_s9 = scalar_lea.hbm %s1603_s3, 64 }
 0x18e   : > { %p1295_p9 = scmp.ne.s32.totalorder %s1554_s27, %s1294_s22  ;;  %p1299_p5 = scmp.lt.u32.totalorder %s1554_s27, %s1603_s3 }
 0x18f   : > { %p1300_p11 = scmp.lt.u32.totalorder %s1298_s9, %s1294_s22  ;;  %p1302_p4 = scmp.lt.u32.totalorder %s1294_s22, %s1554_s27 }
 0x190   : > { %p1296_p2 = pnand %p1295_p9, %p1472_p12 }
 0x191   : > { %p1301_p1 = por %p1300_p11, %p1299_p5 }
 0x192   : > { %p1297_p0 = pneg %p1296_p2 }
 0x193   : > { %p1303_p6 = por %p1302_p4, %p1301_p1 }
 0x195   : > { %p1304_p8 = pnand %p1303_p6, %p1297_p0 }
 0x197   : > { %1307 = shalt.err (!%p1304_p8)
}
 0x198   : > { %s1359_s4 = smov 16   ;;  %s1360_s25 = smov 1  }
 0x199   : > { %1111 = dma.vmem_to_hbm [thread:$0]  (%p1472_p12), %s1556_s5, 32, %s1554_s27, %s836_s28, %s1359_s4, %s1359_s4, %s1360_s25  }
 0x19a PF: > { %s864_s26 = sand.u32 1, %s1338_s12   ;;  %p1618_p10 = scmp.ne.s32.totalorder %s1608_s19, 0 }
 0x19b   : > { %p1619_p13 = scmp.ge.s32.totalorder %s1350_s15, 2  ;;  %s865_s10 = scalar_lea.sflag [#allocation4], %s864_s26 }
 0x19d   : > { %p1122_p3 = pnand %p1619_p13, %p1618_p10 }
 0x19f   : > { %1333 = dma.done.wait (!%p1122_p3), %s865_s10, 32  }
 0x1a0   : > { %1335 = vsyncadd (!%p1122_p3), %s865_s10, 4294967264  ;;  %p17_p7 = scmp.ge.s32.totalorder %s1437_s24, 4   ;;  %s1620_s12 = smov %s1342_s13 }
 0x1a1   : > { %s1621_s13 = smov %s1346_s14  ;;  %s1622_s14 = smov %s1468_s17 }
 0x1a2   : > { %s1623_s15 = smov %s1437_s24  ;;  %19 = sbr.rel (!%p17_p7) target bundleno = 6 (0x6), region = 83 }
 0x1a9   :  { %870 = vsyncpa [#allocation3], 1 }
 0x1aa   :  { %872 = vsyncpa [#allocation3 + $0x1], 1 }
 0x1ab   :  { %873 = vsyncpa [#allocation6], 1 }
 0x1ac   :  { %874 = vsyncpa [#allocation4], 1 }
 0x1ad   :  { %876 = vsyncpa [#allocation4 + $0x1], 1 }

</bundles_post_ra>
